<compile_context>
chip_gen: v7x
topology: tpu7x:2x2x1
jax: 0.10.0
libtpu: 0.0.40
codegen_flags: <defaults>
</compile_context>

<pallas_src>
import functools

import jax
import jax.numpy as jnp
from jax.experimental import pallas as pl
from jax.experimental.pallas import tpu as pltpu


_LANE = 128
_SUBLANE = 8
_VMEM_BUDGET_BYTES = 40 * 1024 * 1024   # tile-sizing target (v7x-safe)
_VMEM_LIMIT_BYTES = 48 * 1024 * 1024    # scoped VMEM limit handed to Mosaic


def _round_up(x, m):
    return ((x + m - 1) // m) * m


def _autoencoder_kernel(x_ref, we_ref, be_ref, wd_ref, bd_ref, out_ref, enc_ref):
    """out[i, j] = (x[i] @ We + be) @ Wd[:, j] + bd[j].

    Grid axis 0 tiles the batch ("parallel"); axis 1 tiles the decoder output
    columns ("arbitrary").  The encoding for the current batch tile is computed
    once (at j == 0) into an f32 VMEM scratch and reused for every output tile.
    """
    @pl.when(pl.program_id(1) == 0)
    def _():
        enc_ref[...] = (
            jnp.dot(x_ref[...], we_ref[...], preferred_element_type=jnp.float32)
            + be_ref[...].astype(jnp.float32)
        )

    enc = enc_ref[...].astype(wd_ref.dtype)          # native-dtype MXU matmul
    dec = (
        jnp.dot(enc, wd_ref[...], preferred_element_type=jnp.float32)
        + bd_ref[...].astype(jnp.float32)
    )
    out_ref[...] = dec.astype(out_ref.dtype)


def _choose_block_p(P, max_block_p):
    # Keep output tiles lane-dense (multiple of 128); otherwise take full P.
    if P <= max_block_p or P % _LANE != 0:
        return P
    return max_block_p


def _vmem_estimate(block_b, P, E_pad, block_p, n_p_tiles, itemsize):
    x_buf = 2 * block_b * P * itemsize                 # double-buffered input
    out_buf = 2 * block_b * block_p * itemsize         # double-buffered output
    enc_w = (P * E_pad + E_pad) * itemsize             # single-buffered We, be
    dec_bufs = 1 if n_p_tiles == 1 else 2
    dec_w = dec_bufs * (E_pad * block_p + block_p) * itemsize
    scratch = block_b * E_pad * 4                      # f32 encoding scratch
    return x_buf + out_buf + enc_w + dec_w + scratch


def _choose_block_b(B, P, E_pad, block_p, n_p_tiles, itemsize, target_b):
    block_b = min(target_b, B)
    if block_b < B:
        block_b = max(_SUBLANE, (block_b // _SUBLANE) * _SUBLANE)
    while (
        _vmem_estimate(block_b, P, E_pad, block_p, n_p_tiles, itemsize)
        > _VMEM_BUDGET_BYTES
        and block_b > _SUBLANE
    ):
        block_b = max(_SUBLANE, ((block_b // 2) // _SUBLANE) * _SUBLANE)
    # TODO(synk): for extreme num_products (encoder weight alone near the VMEM
    # budget), also tile the encoder's P/K axis with a reduction grid axis.
    return block_b


@functools.partial(jax.jit, static_argnames=("block_b", "max_block_p"))
def linear_autoencoder_forward(x, w_enc, b_enc, w_dec, b_dec, *,
                               block_b=256, max_block_p=2048):
    """Fused LinearAutoEncoder forward.

    x:     (B, P)          input (f32 or bf16)
    w_enc: (P, E)          encoder weight, pre-transposed (in, out)
    b_enc: (1, E) or (E,)  encoder bias
    w_dec: (E, P)          decoder weight, pre-transposed (in, out)
    b_dec: (1, P) or (P,)  decoder bias
    """
    B, P = x.shape
    E = w_enc.shape[1]
    dtype = x.dtype
    itemsize = jnp.dtype(dtype).itemsize

    w_enc = w_enc.astype(dtype)
    w_dec = w_dec.astype(dtype)
    b_enc = b_enc.reshape(1, E).astype(dtype)
    b_dec = b_dec.reshape(1, P).astype(dtype)

    # Zero-pad the embedding dim to a full 128-lane multiple.  Padding is
    # mathematically inert: padded encoder columns produce 0 (x@0 + 0) and the
    # corresponding (zero) decoder rows contribute 0.
    E_pad = _round_up(E, _LANE)
    if E_pad != E:
        w_enc = jnp.pad(w_enc, ((0, 0), (0, E_pad - E)))
        b_enc = jnp.pad(b_enc, ((0, 0), (0, E_pad - E)))
        w_dec = jnp.pad(w_dec, ((0, E_pad - E), (0, 0)))

    block_p = _choose_block_p(P, max_block_p)
    n_p_tiles = pl.cdiv(P, block_p)
    block_b = _choose_block_b(B, P, E_pad, block_p, n_p_tiles, itemsize, block_b)
    grid = (pl.cdiv(B, block_b), n_p_tiles)

    # Grid-invariant operands are single-buffered to save VMEM; operands whose
    # block changes across the grid keep the default 2-deep pipeline.
    single = pl.Buffered(1)
    dec_mode = single if n_p_tiles == 1 else None

    flops = 4 * B * P * E_pad          # 2*B*P*E (encode) + 2*B*E*P (decode)
    bytes_accessed = (
        2 * B * P * itemsize                                  # x in + out
        + (P * E_pad + E_pad * P + E_pad + P) * itemsize      # weights + biases
    )

    return pl.pallas_call(
        _autoencoder_kernel,
        out_shape=jax.ShapeDtypeStruct((B, P), dtype),
        grid_spec=pltpu.PrefetchScalarGridSpec(
            num_scalar_prefetch=0,
            grid=grid,
            in_specs=[
                pl.BlockSpec((block_b, P), lambda i, j: (i, 0)),          # x
                pl.BlockSpec((P, E_pad), lambda i, j: (0, 0),
                             pipeline_mode=single),                       # We
                pl.BlockSpec((1, E_pad), lambda i, j: (0, 0),
                             pipeline_mode=single),                       # be
                pl.BlockSpec((E_pad, block_p), lambda i, j: (0, j),
                             pipeline_mode=dec_mode),                     # Wd
                pl.BlockSpec((1, block_p), lambda i, j: (0, j),
                             pipeline_mode=dec_mode),                     # bd
            ],
            out_specs=pl.BlockSpec((block_b, block_p), lambda i, j: (i, j)),
            scratch_shapes=[pltpu.VMEM((block_b, E_pad), jnp.float32)],
        ),
        compiler_params=pltpu.CompilerParams(
            dimension_semantics=("parallel", "arbitrary"),
            vmem_limit_bytes=_VMEM_LIMIT_BYTES,
        ),
        cost_estimate=pl.CostEstimate(
            flops=flops, transcendentals=0, bytes_accessed=bytes_accessed),
    )(x, w_enc, b_enc, w_dec, b_dec)


def init_params(key, num_products, embedding_size, dtype=jnp.float32):
    """Deterministic PyTorch-style nn.Linear init: U(-1/sqrt(fan_in), +)."""
    k1, k2, k3, k4 = jax.random.split(key, 4)
    bound_e = 1.0 / jnp.sqrt(jnp.float32(num_products))
    bound_d = 1.0 / jnp.sqrt(jnp.float32(embedding_size))
    # Stored pre-transposed as (in_features, out_features) for the kernel.
    w_enc = jax.random.uniform(k1, (num_products, embedding_size),
                               minval=-bound_e, maxval=bound_e, dtype=dtype)
    b_enc = jax.random.uniform(k2, (1, embedding_size),
                               minval=-bound_e, maxval=bound_e, dtype=dtype)
    w_dec = jax.random.uniform(k3, (embedding_size, num_products),
                               minval=-bound_d, maxval=bound_d, dtype=dtype)
    b_dec = jax.random.uniform(k4, (1, num_products),
                               minval=-bound_d, maxval=bound_d, dtype=dtype)
    return w_enc, b_enc, w_dec, b_dec


if __name__ == "__main__":
    num_products = 256
    embedding_size = 32     # not a multiple of 128 -> exercises E padding
    batch = 512             # >= 2 batch tiles -> both v7x TensorCores get work

    key = jax.random.PRNGKey(0)
    k_x, k_p = jax.random.split(key)
    x = jax.random.normal(k_x, (batch, num_products), dtype=jnp.float32)
    w_enc, b_enc, w_dec, b_dec = init_params(k_p, num_products, embedding_size)

    # f32 path.
    out = linear_autoencoder_forward(x, w_enc, b_enc, w_dec, b_dec)
    out = jax.block_until_ready(out)
    ref = (x @ w_enc + b_enc) @ w_dec + b_dec
    assert out.shape == (batch, num_products)
    assert jnp.allclose(out, ref, atol=1e-4, rtol=1e-4)

    # bf16 path (no in-kernel upcast) with a ragged batch (last tile partial).
    xb = x[:300].astype(jnp.bfloat16)
    out_bf16 = linear_autoencoder_forward(
        xb,
        w_enc.astype(jnp.bfloat16), b_enc.astype(jnp.bfloat16),
        w_dec.astype(jnp.bfloat16), b_dec.astype(jnp.bfloat16))
    out_bf16 = jax.block_until_ready(out_bf16)
    assert out_bf16.shape == (300, num_products)
    assert jnp.allclose(out_bf16.astype(jnp.float32), ref[:300],
                        atol=0.2, rtol=0.1)

    print("KERNEL_OK")
</pallas_src>

<mosaic_0001>
module attributes {stable_mosaic.version = 11 : i64} {
  func.func @_autoencoder_kernel(%arg0: i32, %arg1: i32, %arg2: memref<256x256xf32, #tpu.memory_space<vmem>>, %arg3: memref<256x128xf32, #tpu.memory_space<vmem>>, %arg4: memref<1x128xf32, #tpu.memory_space<vmem>>, %arg5: memref<128x256xf32, #tpu.memory_space<vmem>>, %arg6: memref<1x256xf32, #tpu.memory_space<vmem>>, %arg7: memref<256x256xf32, #tpu.memory_space<vmem>>, %arg8: memref<256x128xf32, #tpu.memory_space<vmem>>) attributes {dimension_semantics = [#tpu.dimension_semantics<parallel>, #tpu.dimension_semantics<arbitrary>], iteration_bounds = array<i64: 2, 1>, scalar_prefetch = 0 : i64, scratch_operands = 1 : i64, tpu.core_type = #tpu.core_type<tc>, window_params = [{transform_indices = @transform_0, window_bounds = array<i64: 256, 256>}, {pipeline_mode = #tpu.pipeline_mode<synchronous>, transform_indices = @transform_1, window_bounds = array<i64: 256, 128>}, {pipeline_mode = #tpu.pipeline_mode<synchronous>, transform_indices = @transform_2, window_bounds = array<i64: 1, 128>}, {pipeline_mode = #tpu.pipeline_mode<synchronous>, transform_indices = @transform_3, window_bounds = array<i64: 128, 256>}, {pipeline_mode = #tpu.pipeline_mode<synchronous>, transform_indices = @transform_4, window_bounds = array<i64: 1, 256>}, {transform_indices = @transform_5, window_bounds = array<i64: 256, 256>}]} {
    %c0_i32 = arith.constant 0 : i32
    %0 = arith.cmpi eq, %arg1, %c0_i32 : i32
    %1 = arith.extui %0 : i1 to i32
    %c0_i32_0 = arith.constant 0 : i32
    %2 = arith.cmpi ne, %1, %c0_i32_0 : i32
    scf.if %2 {
      %c0_8 = arith.constant 0 : index
      %c0_9 = arith.constant 0 : index
      %10 = vector.load %arg2[%c0_8, %c0_9] : memref<256x256xf32, #tpu.memory_space<vmem>>, vector<256x256xf32>
      %c0_10 = arith.constant 0 : index
      %c0_11 = arith.constant 0 : index
      %11 = vector.load %arg3[%c0_10, %c0_11] : memref<256x128xf32, #tpu.memory_space<vmem>>, vector<256x128xf32>
      %cst_12 = arith.constant dense<0.000000e+00> : vector<256x128xf32>
      %12 = tpu.matmul %10, %11, %cst_12 {dimension_numbers = #tpu.dot_dimension_numbers<[1], [0], [0], [1], [0, 0, 1, 1], [], []>} : vector<256x256xf32>, vector<256x128xf32>, vector<256x128xf32> -> vector<256x128xf32>
      %c0_13 = arith.constant 0 : index
      %c0_14 = arith.constant 0 : index
      %13 = vector.load %arg4[%c0_13, %c0_14] : memref<1x128xf32, #tpu.memory_space<vmem>>, vector<1x128xf32>
      %14 = vector.broadcast %13 : vector<1x128xf32> to vector<256x128xf32>
      %15 = arith.addf %12, %14 : vector<256x128xf32>
      %c0_15 = arith.constant 0 : index
      %c0_16 = arith.constant 0 : index
      %16 = vector.load %arg8[%c0_15, %c0_16] : memref<256x128xf32, #tpu.memory_space<vmem>>, vector<256x128xf32>
      tpu.vector_store %arg8[%c0_15, %c0_16], %15 {strides = array<i32>} : memref<256x128xf32, #tpu.memory_space<vmem>>, vector<256x128xf32>,
    } else {
    }
    %c0 = arith.constant 0 : index
    %c0_1 = arith.constant 0 : index
    %3 = vector.load %arg8[%c0, %c0_1] : memref<256x128xf32, #tpu.memory_space<vmem>>, vector<256x128xf32>
    %c0_2 = arith.constant 0 : index
    %c0_3 = arith.constant 0 : index
    %4 = vector.load %arg5[%c0_2, %c0_3] : memref<128x256xf32, #tpu.memory_space<vmem>>, vector<128x256xf32>
    %cst = arith.constant dense<0.000000e+00> : vector<256x256xf32>
    %5 = tpu.matmul %3, %4, %cst {dimension_numbers = #tpu.dot_dimension_numbers<[1], [0], [0], [1], [0, 0, 1, 1], [], []>} : vector<256x128xf32>, vector<128x256xf32>, vector<256x256xf32> -> vector<256x256xf32>
    %c0_4 = arith.constant 0 : index
    %c0_5 = arith.constant 0 : index
    %6 = vector.load %arg6[%c0_4, %c0_5] : memref<1x256xf32, #tpu.memory_space<vmem>>, vector<1x256xf32>
    %7 = vector.broadcast %6 : vector<1x256xf32> to vector<256x256xf32>
    %8 = arith.addf %5, %7 : vector<256x256xf32>
    %c0_6 = arith.constant 0 : index
    %c0_7 = arith.constant 0 : index
    %9 = vector.load %arg7[%c0_6, %c0_7] : memref<256x256xf32, #tpu.memory_space<vmem>>, vector<256x256xf32>
    tpu.vector_store %arg7[%c0_6, %c0_7], %8 {strides = array<i32>} : memref<256x256xf32, #tpu.memory_space<vmem>>, vector<256x256xf32>,
    return
  }
  func.func @transform_0(%arg0: i32, %arg1: i32) -> (i32, i32) {
    %c0_i32 = arith.constant 0 : i32
    %c0_i32_0 = arith.constant 0 : i32
    return %arg0, %c0_i32 : i32, i32
  }
  func.func @transform_1(%arg0: i32, %arg1: i32) -> (i32, i32) {
    %c0_i32 = arith.constant 0 : i32
    %c0_i32_0 = arith.constant 0 : i32
    %c0_i32_1 = arith.constant 0 : i32
    return %c0_i32, %c0_i32_0 : i32, i32
  }
  func.func @transform_2(%arg0: i32, %arg1: i32) -> (i32, i32) {
    %c0_i32 = arith.constant 0 : i32
    %c0_i32_0 = arith.constant 0 : i32
    %c0_i32_1 = arith.constant 0 : i32
    return %c0_i32, %c0_i32_0 : i32, i32
  }
  func.func @transform_3(%arg0: i32, %arg1: i32) -> (i32, i32) {
    %c0_i32 = arith.constant 0 : i32
    %c0_i32_0 = arith.constant 0 : i32
    return %c0_i32, %arg1 : i32, i32
  }
  func.func @transform_4(%arg0: i32, %arg1: i32) -> (i32, i32) {
    %c0_i32 = arith.constant 0 : i32
    %c0_i32_0 = arith.constant 0 : i32
    return %c0_i32, %arg1 : i32, i32
  }
  func.func @transform_5(%arg0: i32, %arg1: i32) -> (i32, i32) {
    %c0_i32 = arith.constant 0 : i32
    return %arg0, %arg1 : i32, i32
  }
}

</mosaic_0001>

<bundles_post_ra>
// kernel: linear_autoencoder_forward.1
= control target key start
LH: loop header
LB: loop body
LE: loop exit
PB: predicated region body
PF: predicated region fallthrough
CT: control target
= control target key end

     0   :  { %10 = vsyncpa [#allocation4], 0  ;;  %s2037_s0 = inlined_call_operand.vmem [shape: f32[512,256], index: 0, kind: input, shape index: {}]   ;;  %s2038_s1 = inlined_call_operand.vmem [shape: f32[256,128], index: 1, kind: input, shape index: {}]   ;;  %s2039_s2 = inlined_call_operand.vmem [shape: f32[1,128], index: 2, kind: input, shape index: {}]   ;;  %s2040_s3 = inlined_call_operand.vmem [shape: f32[128,256], index: 3, kind: input, shape index: {}]   ;;  %s2041_s4 = inlined_call_operand.vmem [shape: f32[1,256], index: 4, kind: input, shape index: {}]   ;;  %s2042_s5 = inlined_call_operand.hbm [shape: f32[512,256], index: 5, kind: output, shape index: {}]  }
   0x1   :  { %12 = vsyncpa [#allocation4 + $0x1], 0  ;;  %s1438_s18 = smov 0   ;;  %s1440_s19 = smov 0  }
   0x2   :  { %s1442_s20 = smov 0   ;;  %s1444_s21 = smov 0  }
   0x3   :  { %s1446_s22 = smov 0   ;;  %s1448_s23 = smov 0  }
   0x4 LB: > { %s1163_s24 = sadd.s32 4294967295, %s1401_s23   ;;  %s1164_s25 = sadd.s32 4294967294, %s1401_s23   ;;  %s1401_s23 = sphi %s1448_s23, %s18_s23   ;;  %s1397_s22 = sphi %s1446_s22, %s2049_s22   ;;  %s1393_s21 = sphi %s1444_s21, %s2048_s21   ;;  %s1389_s20 = sphi %s1442_s20, %s2047_s20   ;;  %s1385_s19 = sphi %s1440_s19, %s2046_s19   ;;  %s1381_s18 = sphi %s1438_s18, %s2045_s18  }
   0x5   : > { %s30_s26 = sadd.s32 1, %s1397_s22  ;;  %s159_s27 = sadd.s32 1, %s1389_s20 }
   0x6   : > { %p32_p0 = scmp.ge.s32.totalorder %s30_s26, 2  ;;  %p169_p1 = scmp.ne.s32.totalorder %s1389_s20, %s1385_s19 }
   0x7   : > { %p170_p2 = scmp.eq.s32.totalorder %s1163_s24, 1  ;;  %p175_p3 = scmp.ne.s32.totalorder %s1385_s19, %s1381_s18 }
   0x8   : > { %s2051_s26 = smov (%p32_p0, %s30_s26), 0  ;;  %p176_p5 = scmp.eq.s32.totalorder %s1164_s25, 1 }
   0x9   : > { %p1478_p4 = por %p170_p2, %p169_p1  ;;  %s154_s29 = ssub.s32 %s1397_s22, %s2051_s26 }
   0xa   : > { %p1169_p6 = scmp.ge.s32.totalorder %s1401_s23, 1  ;;  %p157_p7 = scmp.eq.s32.totalorder %s154_s29, 0 }
   0xb   : > { %p1485_p8 = por %p176_p5, %p175_p3  ;;  %p227_p9 = scmp.lt.s32.totalorder %s1401_s23, 3 }
   0xc   : > { %s1491_s6 = scalar_select %p157_p7, %s1389_s20, %s159_s27  }
   0xd   : > { %p228_p10 = pnand %p1169_p6, %p227_p9 }
   0xe   : > { %v353_v0 = vld [vmem:[%s2038_s1] sm:$0xff] (!%p228_p10)  ;;  %v354_v1 = vld [vmem:[%s2038_s1 + $0x8] sm:$0xff] (!%p228_p10)  ;;  %v355_v2 = vld [vmem:[%s2038_s1 + $0x10] sm:$0xff] (!%p228_p10)  ;;  %s1171_s13 = sshll.u32 (!%p228_p10), %s1393_s21, 5  ;;  %v1403_v3 = vmov (!%p228_p10), 0.0|0.0   ;;  %s1183_s25 = sshll.u32 (!%p228_p10), %s1393_s21, 13 }
   0xf   : > { %231 = sbr.rel (%p228_p10) target bundleno = 648 (0x288), region = 40  ;;  %1184 = vmatprep.subr.bf16.mxu0 (!%p228_p10), %v1403_v3  ;;  %v1185_v4 = vpack.c.bf16 (!%p228_p10), %v354_v1, %v353_v0  ;;  %v356_v5 = vld [vmem:[%s2038_s1 + $0x18] sm:$0xff] (!%p228_p10)  ;;  %p266_p11 = scmp.lt.s32.totalorder (!%p228_p10), %s1171_s13, 63  ;;  %v357_v7 = vld [vmem:[%s2038_s1 + $0x20] sm:$0xff] (!%p228_p10)  ;;  %v358_v8 = vld [vmem:[%s2038_s1 + $0x28] sm:$0xff] (!%p228_p10) }
  0x10   : > { %v1188_v6 = vpack.c.bf16 (!%p228_p10), %v356_v5, %v355_v2  ;;  %v1191_v9 = vpack.c.bf16 (!%p228_p10), %v358_v8, %v357_v7  ;;  %v359_v10 = vld [vmem:[%s2038_s1 + $0x30] sm:$0xff] (!%p228_p10)  ;;  %v360_v11 = vld [vmem:[%s2038_s1 + $0x38] sm:$0xff] (!%p228_p10)  ;;  %v361_v14 = vld [vmem:[%s2038_s1 + $0x40] sm:$0xff] (!%p228_p10)  ;;  %s1982_s9 = scalar_lea.hbm (!%p228_p10), %s2042_s5, %s1183_s25  ;;  %s1405_s11 = smov (!%p228_p10), [#allocation3]  }
  0x11   : > { %1186 = vmatpush1.bf16.msra.mxu0 (!%p228_p10), %v1185_v4  ;;  %v1194_v13 = vpack.c.bf16 (!%p228_p10), %v360_v11, %v359_v10  ;;  %v362_v15 = vld [vmem:[%s2038_s1 + $0x48] sm:$0xff] (!%p228_p10)  ;;  %v363_v17 = vld [vmem:[%s2038_s1 + $0x50] sm:$0xff] (!%p228_p10)  ;;  %v364_v18 = vld [vmem:[%s2038_s1 + $0x58] sm:$0xff] (!%p228_p10)  ;;  %s1327_s12 = sshll.u32 (!%p228_p10), %s1405_s11, 4  ;;  %s1328_s12 = int_to_ptr.vmem [resolvable:$false] %s1327_s12 }
  0x12   : > { %1187 = vmatprep.subr.bf16.mxu0 (!%p228_p10), %v1403_v3  ;;  %v1197_v16 = vpack.c.bf16 (!%p228_p10), %v362_v15, %v361_v14  ;;  %v1200_v19 = vpack.c.bf16 (!%p228_p10), %v364_v18, %v363_v17  ;;  %v365_v20 = vld [vmem:[%s2038_s1 + $0x60] sm:$0xff] (!%p228_p10)  ;;  %v366_v21 = vld [vmem:[%s2038_s1 + $0x68] sm:$0xff] (!%p228_p10)  ;;  %v367_v23 = vld [vmem:[%s2038_s1 + $0x70] sm:$0xff] (!%p228_p10) }
  0x13   : > { %v1203_v22 = vpack.c.bf16 (!%p228_p10), %v366_v21, %v365_v20  ;;  %v368_v24 = vld [vmem:[%s2038_s1 + $0x78] sm:$0xff] (!%p228_p10)  ;;  %v369_v26 = vld [vmem:[%s2038_s1 + $0x80] sm:$0xff] (!%p228_p10)  ;;  %v370_v27 = vld [vmem:[%s2038_s1 + $0x88] sm:$0xff] (!%p228_p10) }
  0x14   : > { %v1206_v25 = vpack.c.bf16 (!%p228_p10), %v368_v24, %v367_v23  ;;  %v1209_v28 = vpack.c.bf16 (!%p228_p10), %v370_v27, %v369_v26  ;;  %v371_v29 = vld [vmem:[%s2038_s1 + $0x90] sm:$0xff] (!%p228_p10)  ;;  %v372_v30 = vld [vmem:[%s2038_s1 + $0x98] sm:$0xff] (!%p228_p10)  ;;  %v373_v32 = vld [vmem:[%s2038_s1 + $0xa0] sm:$0xff] (!%p228_p10) }
  0x15   : > { %1189 = vmatpush1.bf16.msra.mxu0 (!%p228_p10), %v1188_v6  ;;  %v1212_v31 = vpack.c.bf16 (!%p228_p10), %v372_v30, %v371_v29  ;;  %v374_v33 = vld [vmem:[%s2038_s1 + $0xa8] sm:$0xff] (!%p228_p10)  ;;  %v375_v35 = vld [vmem:[%s2038_s1 + $0xb0] sm:$0xff] (!%p228_p10)  ;;  %v376_v36 = vld [vmem:[%s2038_s1 + $0xb8] sm:$0xff] (!%p228_p10) }
  0x16   : > { %s2053_s13 = smov (!%p266_p11, %s1171_s13), 63  ;;  %1190 = vmatprep.subr.bf16.mxu0 %v1403_v3  ;;  %v1215_v34 = vpack.c.bf16 %v374_v33, %v373_v32  ;;  %v1218_v37 = vpack.c.bf16 %v376_v36, %v375_v35  ;;  %v377_v38 = vld [vmem:[%s2038_s1 + $0xc0] sm:$0xff]  ;;  %v378_v39 = vld [vmem:[%s2038_s1 + $0xc8] sm:$0xff]  ;;  %v379_v41 = vld [vmem:[%s2038_s1 + $0xd0] sm:$0xff] }
  0x17   : > { %s1181_s27 = sshll.u32 %s2053_s13, 4  ;;  %v1221_v40 = vpack.c.bf16 %v378_v39, %v377_v38  ;;  %v380_v42 = vld [vmem:[%s2038_s1 + $0xd8] sm:$0xff]  ;;  %v381_v44 = vld [vmem:[%s2038_s1 + $0xe0] sm:$0xff]  ;;  %v382_v45 = vld [vmem:[%s2038_s1 + $0xe8] sm:$0xff]  ;;  %s1329_s13 = scalar_lea.vmem %s1328_s12, 16384 }
  0x18   : > { %s1517_s8 = scalar_lea.vmem %s2037_s0, %s1181_s27  ;;  %v1224_v43 = vpack.c.bf16 %v380_v42, %v379_v41  ;;  %v1227_v46 = vpack.c.bf16 %v382_v45, %v381_v44  ;;  %v383_v47 = vld [vmem:[%s2038_s1 + $0xf0] sm:$0xff]  ;;  %v384_v48 = vld [vmem:[%s2038_s1 + $0xf8] sm:$0xff]  ;;  %v682_v52 = vld [vmem:[%s2040_s3 + $0x8] sm:$0xff] }
  0x19   : > { %v290_v12 = vld [vmem:[%s1517_s8 + $0x8] sm:$0xff]  ;;  %1192 = vmatpush1.bf16.msra.mxu0 %v1191_v9  ;;  %v1230_v49 = vpack.c.bf16 %v384_v48, %v383_v47  ;;  %v289_v50 = vld [vmem:[%s1517_s8] sm:$0xff]  ;;  %v292_v51 = vld [vmem:[%s1517_s8 + $0x18] sm:$0xff] }
  0x1a   : > { %456 = vmatprep.mubr.f32.mxu0 %v290_v12  ;;  %1193 = vmatprep.subr.bf16.mxu0 %v1403_v3  ;;  %v684_v53 = vld [vmem:[%s2040_s3 + $0x18] sm:$0xff]  ;;  %v681_v54 = vld [vmem:[%s2040_s3] sm:$0xff]  ;;  %v683_v56 = vld [vmem:[%s2040_s3 + $0x10] sm:$0xff] }
  0x1b   : > { %v1232_v55 = vpack.c.bf16 %v684_v53, %v682_v52  ;;  %v686_v57 = vld [vmem:[%s2040_s3 + $0x28] sm:$0xff]  ;;  %v688_v58 = vld [vmem:[%s2040_s3 + $0x38] sm:$0xff]  ;;  %v1234_v59 = vpack.c.bf16 %v683_v56, %v681_v54  ;;  %v685_v61 = vld [vmem:[%s2040_s3 + $0x20] sm:$0xff] }
  0x1c   : > { %v1236_v60 = vpack.c.bf16 %v688_v58, %v686_v57  ;;  %v687_v62 = vld [vmem:[%s2040_s3 + $0x30] sm:$0xff]  ;;  %v690_v63 = vld [vmem:[%s2040_s3 + $0x48] sm:$0xff]  ;;  %v692_v0 = vld [vmem:[%s2040_s3 + $0x58] sm:$0xff] }
  0x1d   : > { %1195 = vmatpush1.bf16.msra.mxu0 %v1194_v13  ;;  %1233 = vmatprep.subr.bf16.mxu1 %v1232_v55  ;;  %v1238_v1 = vpack.c.bf16 %v687_v62, %v685_v61  ;;  %v291_v2 = vld [vmem:[%s1517_s8 + $0x10] sm:$0xff]  ;;  %v689_v4 = vld [vmem:[%s2040_s3 + $0x40] sm:$0xff]  ;;  %v294_v6 = vld [vmem:[%s1517_s8 + $0x28] sm:$0xff] }
  0x1e   : > { %1196 = vmatprep.subr.bf16.mxu0 %v1403_v3  ;;  %1235 = vmatpush1.bf16.msra.mxu1 %v1234_v59  ;;  %v691_v5 = vld [vmem:[%s2040_s3 + $0x50] sm:$0xff]  ;;  %v694_v7 = vld [vmem:[%s2040_s3 + $0x68] sm:$0xff]  ;;  %v696_v8 = vld [vmem:[%s2040_s3 + $0x78] sm:$0xff] }
  0x1f   : > { %1237 = vmatprep.subr.bf16.mxu1 %v1236_v60  ;;  %v1242_v9 = vpack.c.bf16 %v691_v5, %v689_v4  ;;  %v293_v10 = vld [vmem:[%s1517_s8 + $0x20] sm:$0xff]  ;;  %v1244_v11 = vpack.c.bf16 %v696_v8, %v694_v7  ;;  %v695_v13 = vld [vmem:[%s2040_s3 + $0x70] sm:$0xff]  ;;  %v296_v14 = vld [vmem:[%s1517_s8 + $0x38] sm:$0xff] }
  0x20   : > { %v693_v12 = vld [vmem:[%s2040_s3 + $0x60] sm:$0xff]  ;;  %v698_v15 = vld [vmem:[%s2040_s3 + $0x88] sm:$0xff]  ;;  %v295_v18 = vld [vmem:[%s1517_s8 + $0x30] sm:$0xff] }
  0x21   : > { %1198 = vmatpush1.bf16.msra.mxu0 %v1197_v16  ;;  %v700_v16 = vld [vmem:[%s2040_s3 + $0x98] sm:$0xff]  ;;  %v1246_v17 = vpack.c.bf16 %v695_v13, %v693_v12  ;;  %v697_v20 = vld [vmem:[%s2040_s3 + $0x80] sm:$0xff]  ;;  %v699_v21 = vld [vmem:[%s2040_s3 + $0x90] sm:$0xff] }
  0x22   : > { %1199 = vmatprep.subr.bf16.mxu0 %v1403_v3  ;;  %1239 = vmatpush1.bf16.msra.mxu1 %v1238_v1  ;;  %v702_v23 = vld [vmem:[%s2040_s3 + $0xa8] sm:$0xff]  ;;  %v704_v24 = vld [vmem:[%s2040_s3 + $0xb8] sm:$0xff]  ;;  %v297_v26 = vld [vmem:[%s1517_s8 + $0x40] sm:$0xff] }
  0x23   : > { %v1252_v27 = vpack.c.bf16 %v704_v24, %v702_v23  ;;  %v703_v29 = vld [vmem:[%s2040_s3 + $0xb0] sm:$0xff]  ;;  %v300_v30 = vld [vmem:[%s1517_s8 + $0x58] sm:$0xff]  ;;  %v705_v36 = vld [vmem:[%s2040_s3 + $0xc0] sm:$0xff] }
  0x24   : > { %v708_v32 = vld [vmem:[%s2040_s3 + $0xd8] sm:$0xff]  ;;  %v302_v38 = vld [vmem:[%s1517_s8 + $0x68] sm:$0xff]  ;;  %v301_v42 = vld [vmem:[%s1517_s8 + $0x60] sm:$0xff] }
  0x25   : > { %1201 = vmatpush1.bf16.msra.mxu0 %v1200_v19  ;;  %v1248_v19 = vpack.c.bf16 %v700_v16, %v698_v15  ;;  %v710_v39 = vld [vmem:[%s2040_s3 + $0xe8] sm:$0xff]  ;;  %v304_v44 = vld [vmem:[%s1517_s8 + $0x78] sm:$0xff]  ;;  %v303_v45 = vld [vmem:[%s1517_s8 + $0x70] sm:$0xff]  ;;  %v1404_v15 = vmov 0.0  }
  0x26   : > { %1202 = vmatprep.subr.bf16.mxu0 %v1403_v3  ;;  %v305_v47 = vld [vmem:[%s1517_s8 + $0x80] sm:$0xff]  ;;  %v308_v48 = vld [vmem:[%s1517_s8 + $0x98] sm:$0xff]  ;;  %v311_v53 = vld [vmem:[%s1517_s8 + $0xb0] sm:$0xff]  ;;  %789 = vmatprep.mubr.f32.mxu1 %v1404_v15 }
  0x27   : > { %v312_v52 = vld [vmem:[%s1517_s8 + $0xb8] sm:$0xff]  ;;  %v314_v54 = vld [vmem:[%s1517_s8 + $0xc8] sm:$0xff]  ;;  %v313_v55 = vld [vmem:[%s1517_s8 + $0xc0] sm:$0xff] }
  0x28   : > { %v316_v56 = vld [vmem:[%s1517_s8 + $0xd8] sm:$0xff]  ;;  %v315_v57 = vld [vmem:[%s1517_s8 + $0xd0] sm:$0xff]  ;;  %v318_v58 = vld [vmem:[%s1517_s8 + $0xe8] sm:$0xff] }
  0x29   : > { %1204 = vmatpush1.bf16.msra.mxu0 %v1203_v22  ;;  %v298_v22 = vld [vmem:[%s1517_s8 + $0x48] sm:$0xff]  ;;  %v317_v59 = vld [vmem:[%s1517_s8 + $0xe0] sm:$0xff]  ;;  %v320_v60 = vld [vmem:[%s1517_s8 + $0xf8] sm:$0xff] }
  0x2a   : > { %1205 = vmatprep.subr.bf16.mxu0 %v1403_v3  ;;  %v319_v61 = vld [vmem:[%s1517_s8 + $0xf0] sm:$0xff]  ;;  %v322_v62 = vld [vmem:[%s1517_s8 + $0x108] sm:$0xff]  ;;  %v328_v4 = vld [vmem:[%s1517_s8 + $0x138] sm:$0xff] }
  0x2b   : > { %v323_v1 = vld [vmem:[%s1517_s8 + $0x110] sm:$0xff]  ;;  %v329_v7 = vld [vmem:[%s1517_s8 + $0x140] sm:$0xff]  ;;  %v332_v8 = vld [vmem:[%s1517_s8 + $0x158] sm:$0xff] }
  0x2c   : > { %v327_v5 = vld [vmem:[%s1517_s8 + $0x130] sm:$0xff]  ;;  %v334_v13 = vld [vmem:[%s1517_s8 + $0x168] sm:$0xff]  ;;  %v336_v16 = vld [vmem:[%s1517_s8 + $0x178] sm:$0xff] }
  0x2d   : > { %1207 = vmatpush1.bf16.msra.mxu0 %v1206_v25  ;;  %v1250_v25 = vpack.c.bf16 %v699_v21, %v697_v20  ;;  %v340_v20 = vld [vmem:[%s1517_s8 + $0x198] sm:$0xff]  ;;  %v339_v21 = vld [vmem:[%s1517_s8 + $0x190] sm:$0xff]  ;;  %v341_v23 = vld [vmem:[%s1517_s8 + $0x1a0] sm:$0xff] }
  0x2e   : > { %1208 = vmatprep.subr.bf16.mxu0 %v1403_v3  ;;  %v344_v24 = vld [vmem:[%s1517_s8 + $0x1b8] sm:$0xff] }
  0x31   : > { %1210 = vmatpush1.bf16.msra.mxu0 %v1209_v28  ;;  %v701_v28 = vld [vmem:[%s2040_s3 + $0xa0] sm:$0xff] }
  0x32   : > { %1211 = vmatprep.subr.bf16.mxu0 %v1403_v3  ;;  %v1254_v33 = vpack.c.bf16 %v703_v29, %v701_v28  ;;  %v348_v28 = vld [vmem:[%s1517_s8 + $0x1d8] sm:$0xff]  ;;  %v347_v29 = vld [vmem:[%s1517_s8 + $0x1d0] sm:$0xff] }
  0x35   : > { %1213 = vmatpush1.bf16.msra.mxu0 %v1212_v31  ;;  %v706_v31 = vld [vmem:[%s2040_s3 + $0xc8] sm:$0xff] }
  0x36   : > { %1214 = vmatprep.subr.bf16.mxu0 %v1403_v3  ;;  %v1256_v35 = vpack.c.bf16 %v708_v32, %v706_v31  ;;  %v349_v31 = vld [vmem:[%s1517_s8 + $0x1e0] sm:$0xff]  ;;  %v352_v32 = vld [vmem:[%s1517_s8 + $0x1f8] sm:$0xff] }
  0x39   : > { %1216 = vmatpush1.bf16.msra.mxu0 %v1215_v34  ;;  %v299_v34 = vld [vmem:[%s1517_s8 + $0x50] sm:$0xff] }
  0x3a   : > { %1217 = vmatprep.subr.bf16.mxu0 %v1403_v3 }
  0x3d   : > { %1219 = vmatpush1.bf16.msra.mxu0 %v1218_v37  ;;  %v707_v37 = vld [vmem:[%s2040_s3 + $0xd0] sm:$0xff] }
  0x3e   : > { %1220 = vmatprep.subr.bf16.mxu0 %v1403_v3  ;;  %v1258_v41 = vpack.c.bf16 %v707_v37, %v705_v36 }
  0x41   : > { %1222 = vmatpush1.bf16.msra.mxu0 %v1221_v40  ;;  %v712_v40 = vld [vmem:[%s2040_s3 + $0xf8] sm:$0xff] }
  0x42   : > { %1223 = vmatprep.subr.bf16.mxu0 %v1403_v3 }
  0x45   : > { %1225 = vmatpush1.bf16.msra.mxu0 %v1224_v43  ;;  %v1260_v43 = vpack.c.bf16 %v712_v40, %v710_v39 }
  0x46   : > { %1226 = vmatprep.subr.bf16.mxu0 %v1403_v3 }
  0x49   : > { %1228 = vmatpush1.bf16.msra.mxu0 %v1227_v46  ;;  %v306_v46 = vld [vmem:[%s1517_s8 + $0x88] sm:$0xff] }
  0x4a   : > { %1229 = vmatprep.subr.bf16.mxu0 %v1403_v3  ;;  %v1240_v3 = vpack.c.bf16 %v692_v0, %v690_v63  ;;  %v321_v63 = vld [vmem:[%s1517_s8 + $0x100] sm:$0xff]  ;;  %v324_v0 = vld [vmem:[%s1517_s8 + $0x118] sm:$0xff] }
  0x4c   : > { %1241 = vmatprep.subr.bf16.mxu1 %v1240_v3  ;;  %v325_v3 = vld [vmem:[%s1517_s8 + $0x120] sm:$0xff] }
  0x4d   : > { %1231 = vmatpush1.bf16.msra.mxu0 %v1230_v49  ;;  %1243 = vmatpush1.bf16.msra.mxu1 %v1242_v9  ;;  %v307_v49 = vld [vmem:[%s1517_s8 + $0x90] sm:$0xff]  ;;  %v709_v9 = vld [vmem:[%s2040_s3 + $0xe0] sm:$0xff] }
  0x4e   : > { %1245 = vmatprep.subr.bf16.mxu1 %v1244_v11  ;;  %v331_v11 = vld [vmem:[%s1517_s8 + $0x150] sm:$0xff] }
  0x50   : > { %457 = vmatmul.mubr.f32.vlgmr.msra.gmra.mrb[0].mxu0 %v289_v50  ;;  %v310_v50 = vld [vmem:[%s1517_s8 + $0xa8] sm:$0xff] }
  0x51   : > { %461 = vmatprep.mubr.f32.mxu0 %v292_v51  ;;  %1247 = vmatpush1.bf16.msra.mxu1 %v1246_v17  ;;  %v309_v51 = vld [vmem:[%s1517_s8 + $0xa0] sm:$0xff]  ;;  %v335_v17 = vld [vmem:[%s1517_s8 + $0x170] sm:$0xff] }
  0x52   : > { %1249 = vmatprep.subr.bf16.mxu1 %v1248_v19  ;;  %v337_v19 = vld [vmem:[%s1517_s8 + $0x180] sm:$0xff] }
  0x54   : > { %462 = vmatmul.mubr.f32.gmra.mrb[2].mxu0 %v291_v2  ;;  %v326_v2 = vld [vmem:[%s1517_s8 + $0x128] sm:$0xff] }
  0x55   : > { %466 = vmatprep.mubr.f32.mxu0 %v294_v6  ;;  %1251 = vmatpush1.bf16.msra.mxu1 %v1250_v25  ;;  %v330_v6 = vld [vmem:[%s1517_s8 + $0x148] sm:$0xff]  ;;  %v343_v25 = vld [vmem:[%s1517_s8 + $0x1b0] sm:$0xff] }
  0x56   : > { %1253 = vmatprep.subr.bf16.mxu1 %v1252_v27  ;;  %v345_v27 = vld [vmem:[%s1517_s8 + $0x1c0] sm:$0xff] }
  0x58   : > { %467 = vmatmul.mubr.f32.gmra.mrb[4].mxu0 %v293_v10  ;;  %v711_v10 = vld [vmem:[%s2040_s3 + $0xf0] sm:$0xff] }
  0x59   : > { %471 = vmatprep.mubr.f32.mxu0 %v296_v14  ;;  %1255 = vmatpush1.bf16.msra.mxu1 %v1254_v33  ;;  %v1262_v12 = vpack.c.bf16 %v711_v10, %v709_v9  ;;  %v333_v14 = vld [vmem:[%s1517_s8 + $0x160] sm:$0xff]  ;;  %v351_v33 = vld [vmem:[%s1517_s8 + $0x1f0] sm:$0xff] }
  0x5a   : > { %1257 = vmatprep.subr.bf16.mxu1 %v1256_v35 }
  0x5c   : > { %472 = vmatmul.mubr.f32.gmra.mrb[6].mxu0 %v295_v18  ;;  %v338_v18 = vld [vmem:[%s1517_s8 + $0x188] sm:$0xff] }
  0x5d   : > { %476 = vmatprep.mubr.f32.mxu0 %v298_v22  ;;  %1259 = vmatpush1.bf16.msra.mxu1 %v1258_v41  ;;  %v342_v22 = vld [vmem:[%s1517_s8 + $0x1a8] sm:$0xff] }
  0x5e   : > { %1261 = vmatprep.subr.bf16.mxu1 %v1260_v43 }
  0x60   : > { %477 = vmatmul.mubr.f32.gmra.mrb[8].mxu0 %v297_v26  ;;  %v346_v26 = vld [vmem:[%s1517_s8 + $0x1c8] sm:$0xff] }
  0x61   : > { %481 = vmatprep.mubr.f32.mxu0 %v300_v30  ;;  %1263 = vmatpush1.bf16.msra.mxu1 %v1262_v12  ;;  %v350_v30 = vld [vmem:[%s1517_s8 + $0x1e8] sm:$0xff]  ;;  %s262_s8 = sand.u32 1, %s1385_s19  }
  0x62   : > { %s1170_s17 = sshll.u32 %s262_s8, 9  ;;  %s1991_s21 = scalar_lea.sflag [#allocation4], %s262_s8 }
  0x63   : > { %s1852_s24 = scalar_lea.vmem [#allocation3], %s1170_s17 }
  0x64   : > { %482 = vmatmul.mubr.f32.gmra.mrb[10].mxu0 %v299_v34  ;;  %v1775_v34 = vld [vmem:[%s2039_s2] ss:$0 sm:$0xff]  ;;  %s1063_s27 = sshll.u32 %s1852_s24, 4  ;;  %s1984_s27 = int_to_ptr.vmem [resolvable:$true] %s1063_s27 }
  0x65   : > { %486 = vmatprep.mubr.f32.mxu0 %v302_v38  ;;  %s1323_s10 = scalar_lea.vmem %s1984_s27, 8192  ;;  %p1330_p1 = scmp.lt.s32.totalorder %s1984_s27, %s1328_s12 }
  0x66   : > { %p1324_p12 = scmp.ne.s32.totalorder %s1984_s27, %s1323_s10  ;;  %p1331_p2 = scmp.lt.s32.totalorder %s1329_s13, %s1323_s10 }
  0x68   : > { %487 = vmatmul.mubr.f32.gmra.mrb[12].mxu0 %v301_v42  ;;  %p1325_p13 = pnand %p1324_p12, %p1478_p4  ;;  %p1332_p3 = por %p1331_p2, %p1330_p1 }
  0x69   : > { %491 = vmatprep.mubr.f32.mxu0 %v304_v44 }
  0x6a   : > { %p1326_p0 = pneg %p1325_p13 }
  0x6c   : > { %492 = vmatmul.mubr.f32.gmra.mrb[14].mxu0 %v303_v45  ;;  %p1333_p5 = pnand %p1332_p3, %p1326_p0 }
  0x6d   : > { %496 = vmatprep.mubr.f32.mxu0 %v306_v46 }
  0x70   : > { %497 = vmatmul.mubr.f32.gmra.mrb[16].mxu0 %v305_v47 }
  0x71   : > { %501 = vmatprep.mubr.f32.mxu0 %v308_v48 }
  0x74   : > { %502 = vmatmul.mubr.f32.gmra.mrb[18].mxu0 %v307_v49 }
  0x75   : > { %506 = vmatprep.mubr.f32.mxu0 %v310_v50 }
  0x78   : > { %507 = vmatmul.mubr.f32.gmra.mrb[20].mxu0 %v309_v51 }
  0x79   : > { %511 = vmatprep.mubr.f32.mxu0 %v312_v52 }
  0x7c   : > { %512 = vmatmul.mubr.f32.gmra.mrb[22].mxu0 %v311_v53 }
  0x7d   : > { %516 = vmatprep.mubr.f32.mxu0 %v314_v54 }
  0x80   : > { %517 = vmatmul.mubr.f32.gmra.mrb[24].mxu0 %v313_v55 }
  0x81   : > { %521 = vmatprep.mubr.f32.mxu0 %v316_v56 }
  0x84   : > { %522 = vmatmul.mubr.f32.gmra.mrb[26].mxu0 %v315_v57 }
  0x85   : > { %526 = vmatprep.mubr.f32.mxu0 %v318_v58 }
  0x88   : > { %527 = vmatmul.mubr.f32.gmra.mrb[28].mxu0 %v317_v59 }
  0x89   : > { %531 = vmatprep.mubr.f32.mxu0 %v320_v60 }
  0x8c   : > { %532 = vmatmul.mubr.f32.gmra.mrb[30].mxu0 %v319_v61 }
  0x8d   : > { %536 = vmatprep.mubr.f32.mxu0 %v322_v62 }
  0x90   : > { %537 = vmatmul.mubr.f32.gmra.mrb[32].mxu0 %v321_v63 }
  0x91   : > { %541 = vmatprep.mubr.f32.mxu0 %v324_v0 }
  0x94   : > { %542 = vmatmul.mubr.f32.gmra.mrb[34].mxu0 %v323_v1 }
  0x95   : > { %546 = vmatprep.mubr.f32.mxu0 %v326_v2 }
  0x98   : > { %547 = vmatmul.mubr.f32.gmra.mrb[36].mxu0 %v325_v3 }
  0x99   : > { %551 = vmatprep.mubr.f32.mxu0 %v328_v4 }
  0x9c   : > { %552 = vmatmul.mubr.f32.gmra.mrb[38].mxu0 %v327_v5 }
  0x9d   : > { %556 = vmatprep.mubr.f32.mxu0 %v330_v6 }
  0xa0   : > { %557 = vmatmul.mubr.f32.gmra.mrb[40].mxu0 %v329_v7 }
  0xa1   : > { %561 = vmatprep.mubr.f32.mxu0 %v332_v8 }
  0xa4   : > { %562 = vmatmul.mubr.f32.gmra.mrb[42].mxu0 %v331_v11 }
  0xa5   : > { %566 = vmatprep.mubr.f32.mxu0 %v334_v13 }
  0xa8   : > { %567 = vmatmul.mubr.f32.gmra.mrb[44].mxu0 %v333_v14 }
  0xa9   : > { %571 = vmatprep.mubr.f32.mxu0 %v336_v16 }
  0xac   : > { %572 = vmatmul.mubr.f32.gmra.mrb[46].mxu0 %v335_v17 }
  0xad   : > { %576 = vmatprep.mubr.f32.mxu0 %v338_v18 }
  0xb0   : > { %577 = vmatmul.mubr.f32.gmra.mrb[48].mxu0 %v337_v19 }
  0xb1   : > { %581 = vmatprep.mubr.f32.mxu0 %v340_v20 }
  0xb4   : > { %582 = vmatmul.mubr.f32.gmra.mrb[50].mxu0 %v339_v21 }
  0xb5   : > { %586 = vmatprep.mubr.f32.mxu0 %v342_v22 }
  0xb8   : > { %587 = vmatmul.mubr.f32.gmra.mrb[52].mxu0 %v341_v23 }
  0xb9   : > { %591 = vmatprep.mubr.f32.mxu0 %v344_v24 }
  0xbc   : > { %592 = vmatmul.mubr.f32.gmra.mrb[54].mxu0 %v343_v25 }
  0xbd   : > { %596 = vmatprep.mubr.f32.mxu0 %v346_v26 }
  0xc0   : > { %597 = vmatmul.mubr.f32.gmra.mrb[56].mxu0 %v345_v27 }
  0xc1   : > { %601 = vmatprep.mubr.f32.mxu0 %v348_v28 }
  0xc4   : > { %602 = vmatmul.mubr.f32.gmra.mrb[58].mxu0 %v347_v29 }
  0xc5   : > { %606 = vmatprep.mubr.f32.mxu0 %v350_v30 }
  0xc8   : > { %607 = vmatmul.mubr.f32.gmra.mrb[60].mxu0 %v349_v31 }
  0xc9   : > { %611 = vmatprep.mubr.f32.mxu0 %v352_v32 }
  0xcc   : > { %612 = vmatmul.mubr.f32.gmra.mrb[62].mxu0 %v351_v33 }
 0x123   : > { %v458_v35 = vpop.f32.mrb[0].mxu0 }
 0x124   : > { %v459_v36 = vadd.f32 %v1775_v34, %v458_v35  ;;  %v460_v37 = vpop.f32.mrb[1].mxu0 }
 0x126   : > { %790 = vmatmul.mubr.f32.vlgmr.msra.gmra.mrb[0].mxu1 %v459_v36 }
 0x127   : > { %v463_v38 = vpop.f32.mrb[2].mxu0  ;;  %795 = vmatprep.mubr.f32.mxu1 %v1404_v15 }
 0x128   : > { %v464_v39 = vadd.f32 %v1775_v34, %v463_v38  ;;  %v465_v40 = vpop.f32.mrb[3].mxu0 }
 0x12a   : > { %796 = vmatmul.mubr.f32.gmra.mrb[2].mxu1 %v464_v39 }
 0x12b   : > { %v468_v41 = vpop.f32.mrb[4].mxu0  ;;  %801 = vmatprep.mubr.f32.mxu1 %v1404_v15 }
 0x12c   : > { %v469_v42 = vadd.f32 %v1775_v34, %v468_v41  ;;  %v470_v43 = vpop.f32.mrb[5].mxu0 }
 0x12e   : > { %802 = vmatmul.mubr.f32.gmra.mrb[4].mxu1 %v469_v42 }
 0x12f   : > { %v473_v44 = vpop.f32.mrb[6].mxu0  ;;  %807 = vmatprep.mubr.f32.mxu1 %v1404_v15 }
 0x130   : > { %v474_v45 = vadd.f32 %v1775_v34, %v473_v44  ;;  %v475_v46 = vpop.f32.mrb[7].mxu0 }
 0x132   : > { %808 = vmatmul.mubr.f32.gmra.mrb[6].mxu1 %v474_v45 }
 0x133   : > { %v478_v47 = vpop.f32.mrb[8].mxu0  ;;  %813 = vmatprep.mubr.f32.mxu1 %v1404_v15 }
 0x134   : > { %v479_v48 = vadd.f32 %v1775_v34, %v478_v47  ;;  %v480_v49 = vpop.f32.mrb[9].mxu0 }
 0x136   : > { %814 = vmatmul.mubr.f32.gmra.mrb[8].mxu1 %v479_v48 }
 0x137   : > { %v483_v50 = vpop.f32.mrb[10].mxu0  ;;  %819 = vmatprep.mubr.f32.mxu1 %v1404_v15 }
 0x138   : > { %v484_v51 = vadd.f32 %v1775_v34, %v483_v50  ;;  %v485_v52 = vpop.f32.mrb[11].mxu0 }
 0x13a   : > { %820 = vmatmul.mubr.f32.gmra.mrb[10].mxu1 %v484_v51 }
 0x13b   : > { %v488_v53 = vpop.f32.mrb[12].mxu0  ;;  %825 = vmatprep.mubr.f32.mxu1 %v1404_v15 }
 0x13c   : > { %v489_v54 = vadd.f32 %v1775_v34, %v488_v53  ;;  %v490_v55 = vpop.f32.mrb[13].mxu0 }
 0x13e   : > { %826 = vmatmul.mubr.f32.gmra.mrb[12].mxu1 %v489_v54 }
 0x13f   : > { %v493_v56 = vpop.f32.mrb[14].mxu0  ;;  %831 = vmatprep.mubr.f32.mxu1 %v1404_v15 }
 0x140   : > { %v494_v57 = vadd.f32 %v1775_v34, %v493_v56  ;;  %v495_v58 = vpop.f32.mrb[15].mxu0 }
 0x142   : > { %832 = vmatmul.mubr.f32.gmra.mrb[14].mxu1 %v494_v57 }
 0x143   : > { %v498_v59 = vpop.f32.mrb[16].mxu0  ;;  %837 = vmatprep.mubr.f32.mxu1 %v1404_v15 }
 0x144   : > { %v499_v60 = vadd.f32 %v1775_v34, %v498_v59  ;;  %v500_v61 = vpop.f32.mrb[17].mxu0 }
 0x146   : > { %838 = vmatmul.mubr.f32.gmra.mrb[16].mxu1 %v499_v60 }
 0x147   : > { %v503_v62 = vpop.f32.mrb[18].mxu0  ;;  %843 = vmatprep.mubr.f32.mxu1 %v1404_v15 }
 0x148   : > { %v504_v63 = vadd.f32 %v1775_v34, %v503_v62  ;;  %v505_v0 = vpop.f32.mrb[19].mxu0 }
 0x14a   : > { %844 = vmatmul.mubr.f32.gmra.mrb[18].mxu1 %v504_v63 }
 0x14b   : > { %v508_v1 = vpop.f32.mrb[20].mxu0  ;;  %849 = vmatprep.mubr.f32.mxu1 %v1404_v15 }
 0x14c   : > { %v509_v2 = vadd.f32 %v1775_v34, %v508_v1  ;;  %v510_v3 = vpop.f32.mrb[21].mxu0 }
 0x14e   : > { %850 = vmatmul.mubr.f32.gmra.mrb[20].mxu1 %v509_v2 }
 0x14f   : > { %v513_v4 = vpop.f32.mrb[22].mxu0  ;;  %855 = vmatprep.mubr.f32.mxu1 %v1404_v15 }
 0x150   : > { %v514_v5 = vadd.f32 %v1775_v34, %v513_v4  ;;  %v515_v6 = vpop.f32.mrb[23].mxu0 }
 0x152   : > { %856 = vmatmul.mubr.f32.gmra.mrb[22].mxu1 %v514_v5  ;;  %v715_v5 = vlaneseq }
 0x153   : > { %v518_v7 = vpop.f32.mrb[24].mxu0  ;;  %861 = vmatprep.mubr.f32.mxu1 %v1404_v15 }
 0x154   : > { %v519_v8 = vadd.f32 %v1775_v34, %v518_v7  ;;  %v520_v9 = vpop.f32.mrb[25].mxu0  ;;  %v716_v6 = vshrl.u32 %v715_v5, 7 }
 0x156   : > { %862 = vmatmul.mubr.f32.gmra.mrb[24].mxu1 %v519_v8  ;;  %v717_v7 = vsub.s32 0, %v716_v6  ;;  %v713_v8 = vld [vmem:[%s2041_s4] sm:$0x3]  ;;  %v721_v9 = vsub.s32 1, %v716_v6 }
 0x157   : > { %v523_v10 = vpop.f32.mrb[26].mxu0  ;;  %867 = vmatprep.mubr.f32.mxu1 %v1404_v15 }
 0x158   : > { %v524_v11 = vadd.f32 %v1775_v34, %v523_v10  ;;  %v525_v12 = vpop.f32.mrb[27].mxu0  ;;  %v1846_v10 = vrot.slane %v713_v8, %v717_v7 }
 0x15a   : > { %868 = vmatmul.mubr.f32.gmra.mrb[26].mxu1 %v524_v11  ;;  %v1848_v11 = vrot.slane %v713_v8, %v721_v9 }
 0x15b   : > { %v528_v13 = vpop.f32.mrb[28].mxu0  ;;  %873 = vmatprep.mubr.f32.mxu1 %v1404_v15 }
 0x15c   : > { %v529_v14 = vadd.f32 %v1775_v34, %v528_v13  ;;  %v530_v16 = vpop.f32.mrb[29].mxu0 }
 0x15e   : > { %874 = vmatmul.mubr.f32.gmra.mrb[28].mxu1 %v529_v14 }
 0x15f   : > { %v533_v17 = vpop.f32.mrb[30].mxu0  ;;  %879 = vmatprep.mubr.f32.mxu1 %v1404_v15 }
 0x160   : > { %v534_v18 = vadd.f32 %v1775_v34, %v533_v17  ;;  %v535_v19 = vpop.f32.mrb[31].mxu0 }
 0x162   : > { %880 = vmatmul.mubr.f32.gmra.mrb[30].mxu1 %v534_v18 }
 0x163   : > { %v538_v20 = vpop.f32.mrb[32].mxu0  ;;  %885 = vmatprep.mubr.f32.mxu1 %v1404_v15 }
 0x164   : > { %v539_v21 = vadd.f32 %v1775_v34, %v538_v20  ;;  %v540_v22 = vpop.f32.mrb[33].mxu0 }
 0x166   : > { %886 = vmatmul.mubr.f32.gmra.mrb[32].mxu1 %v539_v21 }
 0x167   : > { %v543_v23 = vpop.f32.mrb[34].mxu0  ;;  %891 = vmatprep.mubr.f32.mxu1 %v1404_v15 }
 0x168   : > { %v544_v24 = vadd.f32 %v1775_v34, %v543_v23  ;;  %v545_v25 = vpop.f32.mrb[35].mxu0 }
 0x16a   : > { %892 = vmatmul.mubr.f32.gmra.mrb[34].mxu1 %v544_v24 }
 0x16b   : > { %v548_v26 = vpop.f32.mrb[36].mxu0  ;;  %897 = vmatprep.mubr.f32.mxu1 %v1404_v15 }
 0x16c   : > { %v549_v27 = vadd.f32 %v1775_v34, %v548_v26  ;;  %v550_v28 = vpop.f32.mrb[37].mxu0 }
 0x16e   : > { %898 = vmatmul.mubr.f32.gmra.mrb[36].mxu1 %v549_v27 }
 0x16f   : > { %v553_v29 = vpop.f32.mrb[38].mxu0  ;;  %903 = vmatprep.mubr.f32.mxu1 %v1404_v15 }
 0x170   : > { %v554_v30 = vadd.f32 %v1775_v34, %v553_v29  ;;  %v555_v31 = vpop.f32.mrb[39].mxu0 }
 0x172   : > { %904 = vmatmul.mubr.f32.gmra.mrb[38].mxu1 %v554_v30 }
 0x173   : > { %v558_v32 = vpop.f32.mrb[40].mxu0  ;;  %909 = vmatprep.mubr.f32.mxu1 %v1404_v15 }
 0x174   : > { %v559_v33 = vadd.f32 %v1775_v34, %v558_v32  ;;  %v560_v35 = vpop.f32.mrb[41].mxu0 }
 0x176   : > { %910 = vmatmul.mubr.f32.gmra.mrb[40].mxu1 %v559_v33 }
 0x177   : > { %v563_v36 = vpop.f32.mrb[42].mxu0  ;;  %915 = vmatprep.mubr.f32.mxu1 %v1404_v15 }
 0x178   : > { %v564_v37 = vadd.f32 %v1775_v34, %v563_v36  ;;  %v565_v38 = vpop.f32.mrb[43].mxu0 }
 0x17a   : > { %916 = vmatmul.mubr.f32.gmra.mrb[42].mxu1 %v564_v37 }
 0x17b   : > { %v568_v39 = vpop.f32.mrb[44].mxu0  ;;  %921 = vmatprep.mubr.f32.mxu1 %v1404_v15 }
 0x17c   : > { %v569_v40 = vadd.f32 %v1775_v34, %v568_v39  ;;  %v570_v41 = vpop.f32.mrb[45].mxu0 }
 0x17e   : > { %922 = vmatmul.mubr.f32.gmra.mrb[44].mxu1 %v569_v40 }
 0x17f   : > { %v573_v42 = vpop.f32.mrb[46].mxu0  ;;  %927 = vmatprep.mubr.f32.mxu1 %v1404_v15 }
 0x180   : > { %v574_v43 = vadd.f32 %v1775_v34, %v573_v42  ;;  %v575_v44 = vpop.f32.mrb[47].mxu0 }
 0x182   : > { %928 = vmatmul.mubr.f32.gmra.mrb[46].mxu1 %v574_v43 }
 0x183   : > { %v578_v45 = vpop.f32.mrb[48].mxu0  ;;  %933 = vmatprep.mubr.f32.mxu1 %v1404_v15 }
 0x184   : > { %v579_v46 = vadd.f32 %v1775_v34, %v578_v45  ;;  %v580_v47 = vpop.f32.mrb[49].mxu0 }
 0x186   : > { %934 = vmatmul.mubr.f32.gmra.mrb[48].mxu1 %v579_v46 }
 0x187   : > { %v583_v48 = vpop.f32.mrb[50].mxu0  ;;  %939 = vmatprep.mubr.f32.mxu1 %v1404_v15 }
 0x188   : > { %v584_v49 = vadd.f32 %v1775_v34, %v583_v48  ;;  %v585_v50 = vpop.f32.mrb[51].mxu0 }
 0x18a   : > { %940 = vmatmul.mubr.f32.gmra.mrb[50].mxu1 %v584_v49 }
 0x18b   : > { %v588_v51 = vpop.f32.mrb[52].mxu0  ;;  %945 = vmatprep.mubr.f32.mxu1 %v1404_v15 }
 0x18c   : > { %v589_v52 = vadd.f32 %v1775_v34, %v588_v51  ;;  %v590_v53 = vpop.f32.mrb[53].mxu0 }
 0x18e   : > { %946 = vmatmul.mubr.f32.gmra.mrb[52].mxu1 %v589_v52 }
 0x18f   : > { %v593_v54 = vpop.f32.mrb[54].mxu0  ;;  %951 = vmatprep.mubr.f32.mxu1 %v1404_v15 }
 0x190   : > { %v594_v55 = vadd.f32 %v1775_v34, %v593_v54  ;;  %v595_v56 = vpop.f32.mrb[55].mxu0 }
 0x192   : > { %952 = vmatmul.mubr.f32.gmra.mrb[54].mxu1 %v594_v55 }
 0x193   : > { %v598_v57 = vpop.f32.mrb[56].mxu0  ;;  %957 = vmatprep.mubr.f32.mxu1 %v1404_v15 }
 0x194   : > { %v599_v58 = vadd.f32 %v1775_v34, %v598_v57  ;;  %v600_v59 = vpop.f32.mrb[57].mxu0 }
 0x196   : > { %958 = vmatmul.mubr.f32.gmra.mrb[56].mxu1 %v599_v58 }
 0x197   : > { %v603_v60 = vpop.f32.mrb[58].mxu0  ;;  %963 = vmatprep.mubr.f32.mxu1 %v1404_v15 }
 0x198   : > { %v604_v61 = vadd.f32 %v1775_v34, %v603_v60  ;;  %v605_v62 = vpop.f32.mrb[59].mxu0 }
 0x19a   : > { %964 = vmatmul.mubr.f32.gmra.mrb[58].mxu1 %v604_v61 }
 0x19b   : > { %v608_v63 = vpop.f32.mrb[60].mxu0  ;;  %969 = vmatprep.mubr.f32.mxu1 %v1404_v15 }
 0x19c   : > { %v609_v0 = vadd.f32 %v1775_v34, %v608_v63  ;;  %v610_v1 = vpop.f32.mrb[61].mxu0 }
 0x19e   : > { %970 = vmatmul.mubr.f32.gmra.mrb[60].mxu1 %v609_v0 }
 0x19f   : > { %v613_v2 = vpop.f32.mrb[62].mxu0  ;;  %975 = vmatprep.mubr.f32.mxu1 %v1404_v15 }
 0x1a0   : > { %v614_v3 = vadd.f32 %v1775_v34, %v613_v2  ;;  %v615_v4 = vpop.f32.mrb[63].mxu0 }
 0x1a2   : > { %976 = vmatmul.mubr.f32.gmra.mrb[62].mxu1 %v614_v3 }
 0x1f9   : > { %v791_v15 = vpop.f32.mrb[0].mxu1 }
 0x1fa   : > { %v792_v34 = vadd.f32 %v791_v15, %v1846_v10  ;;  %v793_v12 = vpop.f32.mrb[1].mxu1 }
 0x1fb   : > { %v794_v13 = vadd.f32 %v793_v12, %v1848_v11 }
 0x1fc   : > { %982 = vst [vmem:[%s1852_s24] sm:$0xff] %v792_v34 }
 0x1fd   : > { %983 = vst [vmem:[%s1852_s24 + $0x8] sm:$0xff] %v794_v13  ;;  %v797_v14 = vpop.f32.mrb[2].mxu1 }
 0x1fe   : > { %v798_v16 = vadd.f32 %v797_v14, %v1846_v10  ;;  %v799_v17 = vpop.f32.mrb[3].mxu1 }
 0x1ff   : > { %v800_v18 = vadd.f32 %v799_v17, %v1848_v11 }
 0x200   : > { %984 = vst [vmem:[%s1852_s24 + $0x10] sm:$0xff] %v798_v16 }
 0x201   : > { %985 = vst [vmem:[%s1852_s24 + $0x18] sm:$0xff] %v800_v18  ;;  %v803_v19 = vpop.f32.mrb[4].mxu1 }
 0x202   : > { %v804_v20 = vadd.f32 %v803_v19, %v1846_v10  ;;  %v805_v21 = vpop.f32.mrb[5].mxu1 }
 0x203   : > { %v806_v22 = vadd.f32 %v805_v21, %v1848_v11 }
 0x204   : > { %986 = vst [vmem:[%s1852_s24 + $0x20] sm:$0xff] %v804_v20 }
 0x205   : > { %987 = vst [vmem:[%s1852_s24 + $0x28] sm:$0xff] %v806_v22  ;;  %v809_v23 = vpop.f32.mrb[6].mxu1 }
 0x206   : > { %v810_v24 = vadd.f32 %v809_v23, %v1846_v10  ;;  %v811_v25 = vpop.f32.mrb[7].mxu1 }
 0x207   : > { %v812_v26 = vadd.f32 %v811_v25, %v1848_v11 }
 0x208   : > { %988 = vst [vmem:[%s1852_s24 + $0x30] sm:$0xff] %v810_v24 }
 0x209   : > { %989 = vst [vmem:[%s1852_s24 + $0x38] sm:$0xff] %v812_v26  ;;  %v815_v27 = vpop.f32.mrb[8].mxu1 }
 0x20a   : > { %v816_v28 = vadd.f32 %v815_v27, %v1846_v10  ;;  %v817_v29 = vpop.f32.mrb[9].mxu1 }
 0x20b   : > { %v818_v30 = vadd.f32 %v817_v29, %v1848_v11 }
 0x20c   : > { %990 = vst [vmem:[%s1852_s24 + $0x40] sm:$0xff] %v816_v28 }
 0x20d   : > { %991 = vst [vmem:[%s1852_s24 + $0x48] sm:$0xff] %v818_v30  ;;  %v821_v31 = vpop.f32.mrb[10].mxu1 }
 0x20e   : > { %v822_v32 = vadd.f32 %v821_v31, %v1846_v10  ;;  %v823_v33 = vpop.f32.mrb[11].mxu1 }
 0x20f   : > { %v824_v35 = vadd.f32 %v823_v33, %v1848_v11 }
 0x210   : > { %992 = vst [vmem:[%s1852_s24 + $0x50] sm:$0xff] %v822_v32 }
 0x211   : > { %993 = vst [vmem:[%s1852_s24 + $0x58] sm:$0xff] %v824_v35  ;;  %v827_v36 = vpop.f32.mrb[12].mxu1 }
 0x212   : > { %v828_v37 = vadd.f32 %v827_v36, %v1846_v10  ;;  %v829_v38 = vpop.f32.mrb[13].mxu1 }
 0x213   : > { %v830_v39 = vadd.f32 %v829_v38, %v1848_v11 }
 0x214   : > { %994 = vst [vmem:[%s1852_s24 + $0x60] sm:$0xff] %v828_v37 }
 0x215   : > { %995 = vst [vmem:[%s1852_s24 + $0x68] sm:$0xff] %v830_v39  ;;  %v833_v40 = vpop.f32.mrb[14].mxu1 }
 0x216   : > { %v834_v41 = vadd.f32 %v833_v40, %v1846_v10  ;;  %v835_v42 = vpop.f32.mrb[15].mxu1 }
 0x217   : > { %v836_v43 = vadd.f32 %v835_v42, %v1848_v11 }
 0x218   : > { %996 = vst [vmem:[%s1852_s24 + $0x70] sm:$0xff] %v834_v41 }
 0x219   : > { %997 = vst [vmem:[%s1852_s24 + $0x78] sm:$0xff] %v836_v43  ;;  %v839_v44 = vpop.f32.mrb[16].mxu1 }
 0x21a   : > { %v840_v45 = vadd.f32 %v839_v44, %v1846_v10  ;;  %v841_v46 = vpop.f32.mrb[17].mxu1 }
 0x21b   : > { %v842_v47 = vadd.f32 %v841_v46, %v1848_v11 }
 0x21c   : > { %998 = vst [vmem:[%s1852_s24 + $0x80] sm:$0xff] %v840_v45 }
 0x21d   : > { %999 = vst [vmem:[%s1852_s24 + $0x88] sm:$0xff] %v842_v47  ;;  %v845_v48 = vpop.f32.mrb[18].mxu1 }
 0x21e   : > { %v846_v49 = vadd.f32 %v845_v48, %v1846_v10  ;;  %v847_v50 = vpop.f32.mrb[19].mxu1 }
 0x21f   : > { %v848_v51 = vadd.f32 %v847_v50, %v1848_v11 }
 0x220   : > { %1000 = vst [vmem:[%s1852_s24 + $0x90] sm:$0xff] %v846_v49 }
 0x221   : > { %1001 = vst [vmem:[%s1852_s24 + $0x98] sm:$0xff] %v848_v51  ;;  %v851_v52 = vpop.f32.mrb[20].mxu1 }
 0x222   : > { %v852_v53 = vadd.f32 %v851_v52, %v1846_v10  ;;  %v853_v54 = vpop.f32.mrb[21].mxu1 }
 0x223   : > { %v854_v55 = vadd.f32 %v853_v54, %v1848_v11 }
 0x224   : > { %1002 = vst [vmem:[%s1852_s24 + $0xa0] sm:$0xff] %v852_v53 }
 0x225   : > { %1003 = vst [vmem:[%s1852_s24 + $0xa8] sm:$0xff] %v854_v55  ;;  %v857_v56 = vpop.f32.mrb[22].mxu1 }
 0x226   : > { %v858_v57 = vadd.f32 %v857_v56, %v1846_v10  ;;  %v859_v58 = vpop.f32.mrb[23].mxu1 }
 0x227   : > { %v860_v59 = vadd.f32 %v859_v58, %v1848_v11 }
 0x228   : > { %1004 = vst [vmem:[%s1852_s24 + $0xb0] sm:$0xff] %v858_v57 }
 0x229   : > { %1005 = vst [vmem:[%s1852_s24 + $0xb8] sm:$0xff] %v860_v59  ;;  %v863_v60 = vpop.f32.mrb[24].mxu1 }
 0x22a   : > { %v864_v61 = vadd.f32 %v863_v60, %v1846_v10  ;;  %v865_v62 = vpop.f32.mrb[25].mxu1 }
 0x22b   : > { %v866_v63 = vadd.f32 %v865_v62, %v1848_v11 }
 0x22c   : > { %1006 = vst [vmem:[%s1852_s24 + $0xc0] sm:$0xff] %v864_v61 }
 0x22d   : > { %1007 = vst [vmem:[%s1852_s24 + $0xc8] sm:$0xff] %v866_v63  ;;  %v869_v0 = vpop.f32.mrb[26].mxu1 }
 0x22e   : > { %v870_v1 = vadd.f32 %v869_v0, %v1846_v10  ;;  %v871_v2 = vpop.f32.mrb[27].mxu1 }
 0x22f   : > { %v872_v3 = vadd.f32 %v871_v2, %v1848_v11 }
 0x230   : > { %1008 = vst [vmem:[%s1852_s24 + $0xd0] sm:$0xff] %v870_v1 }
 0x231   : > { %1009 = vst [vmem:[%s1852_s24 + $0xd8] sm:$0xff] %v872_v3  ;;  %v875_v4 = vpop.f32.mrb[28].mxu1 }
 0x232   : > { %v876_v5 = vadd.f32 %v875_v4, %v1846_v10  ;;  %v877_v6 = vpop.f32.mrb[29].mxu1 }
 0x233   : > { %v878_v7 = vadd.f32 %v877_v6, %v1848_v11 }
 0x234   : > { %1010 = vst [vmem:[%s1852_s24 + $0xe0] sm:$0xff] %v876_v5 }
 0x235   : > { %1011 = vst [vmem:[%s1852_s24 + $0xe8] sm:$0xff] %v878_v7  ;;  %v881_v8 = vpop.f32.mrb[30].mxu1 }
 0x236   : > { %v882_v9 = vadd.f32 %v881_v8, %v1846_v10  ;;  %v883_v15 = vpop.f32.mrb[31].mxu1 }
 0x237   : > { %v884_v34 = vadd.f32 %v883_v15, %v1848_v11 }
 0x238   : > { %1012 = vst [vmem:[%s1852_s24 + $0xf0] sm:$0xff] %v882_v9 }
 0x239   : > { %1013 = vst [vmem:[%s1852_s24 + $0xf8] sm:$0xff] %v884_v34  ;;  %v887_v12 = vpop.f32.mrb[32].mxu1 }
 0x23a   : > { %v888_v13 = vadd.f32 %v887_v12, %v1846_v10  ;;  %v889_v14 = vpop.f32.mrb[33].mxu1 }
 0x23b   : > { %v890_v16 = vadd.f32 %v889_v14, %v1848_v11 }
 0x23c   : > { %1014 = vst [vmem:[%s1852_s24 + $0x100] sm:$0xff] %v888_v13 }
 0x23d   : > { %1015 = vst [vmem:[%s1852_s24 + $0x108] sm:$0xff] %v890_v16  ;;  %v893_v17 = vpop.f32.mrb[34].mxu1 }
 0x23e   : > { %v894_v18 = vadd.f32 %v893_v17, %v1846_v10  ;;  %v895_v19 = vpop.f32.mrb[35].mxu1 }
 0x23f   : > { %v896_v20 = vadd.f32 %v895_v19, %v1848_v11 }
 0x240   : > { %1016 = vst [vmem:[%s1852_s24 + $0x110] sm:$0xff] %v894_v18 }
 0x241   : > { %1017 = vst [vmem:[%s1852_s24 + $0x118] sm:$0xff] %v896_v20  ;;  %v899_v21 = vpop.f32.mrb[36].mxu1 }
 0x242   : > { %v900_v22 = vadd.f32 %v899_v21, %v1846_v10  ;;  %v901_v23 = vpop.f32.mrb[37].mxu1 }
 0x243   : > { %v902_v24 = vadd.f32 %v901_v23, %v1848_v11 }
 0x244   : > { %1018 = vst [vmem:[%s1852_s24 + $0x120] sm:$0xff] %v900_v22 }
 0x245   : > { %1019 = vst [vmem:[%s1852_s24 + $0x128] sm:$0xff] %v902_v24  ;;  %v905_v25 = vpop.f32.mrb[38].mxu1 }
 0x246   : > { %v906_v26 = vadd.f32 %v905_v25, %v1846_v10  ;;  %v907_v27 = vpop.f32.mrb[39].mxu1 }
 0x247   : > { %v908_v28 = vadd.f32 %v907_v27, %v1848_v11 }
 0x248   : > { %1020 = vst [vmem:[%s1852_s24 + $0x130] sm:$0xff] %v906_v26 }
 0x249   : > { %1021 = vst [vmem:[%s1852_s24 + $0x138] sm:$0xff] %v908_v28  ;;  %v911_v29 = vpop.f32.mrb[40].mxu1 }
 0x24a   : > { %v912_v30 = vadd.f32 %v911_v29, %v1846_v10  ;;  %v913_v31 = vpop.f32.mrb[41].mxu1 }
 0x24b   : > { %v914_v32 = vadd.f32 %v913_v31, %v1848_v11 }
 0x24c   : > { %1022 = vst [vmem:[%s1852_s24 + $0x140] sm:$0xff] %v912_v30 }
 0x24d   : > { %1023 = vst [vmem:[%s1852_s24 + $0x148] sm:$0xff] %v914_v32  ;;  %v917_v33 = vpop.f32.mrb[42].mxu1 }
 0x24e   : > { %v918_v35 = vadd.f32 %v917_v33, %v1846_v10  ;;  %v919_v36 = vpop.f32.mrb[43].mxu1 }
 0x24f   : > { %v920_v37 = vadd.f32 %v919_v36, %v1848_v11 }
 0x250   : > { %1024 = vst [vmem:[%s1852_s24 + $0x150] sm:$0xff] %v918_v35 }
 0x251   : > { %1025 = vst [vmem:[%s1852_s24 + $0x158] sm:$0xff] %v920_v37  ;;  %v923_v38 = vpop.f32.mrb[44].mxu1 }
 0x252   : > { %v924_v39 = vadd.f32 %v923_v38, %v1846_v10  ;;  %v925_v40 = vpop.f32.mrb[45].mxu1 }
 0x253   : > { %v926_v41 = vadd.f32 %v925_v40, %v1848_v11 }
 0x254   : > { %1026 = vst [vmem:[%s1852_s24 + $0x160] sm:$0xff] %v924_v39 }
 0x255   : > { %1027 = vst [vmem:[%s1852_s24 + $0x168] sm:$0xff] %v926_v41  ;;  %v929_v42 = vpop.f32.mrb[46].mxu1 }
 0x256   : > { %v930_v43 = vadd.f32 %v929_v42, %v1846_v10  ;;  %v931_v44 = vpop.f32.mrb[47].mxu1 }
 0x257   : > { %v932_v45 = vadd.f32 %v931_v44, %v1848_v11 }
 0x258   : > { %1028 = vst [vmem:[%s1852_s24 + $0x170] sm:$0xff] %v930_v43 }
 0x259   : > { %1029 = vst [vmem:[%s1852_s24 + $0x178] sm:$0xff] %v932_v45  ;;  %v935_v46 = vpop.f32.mrb[48].mxu1 }
 0x25a   : > { %v936_v47 = vadd.f32 %v935_v46, %v1846_v10  ;;  %v937_v48 = vpop.f32.mrb[49].mxu1 }
 0x25b   : > { %v938_v49 = vadd.f32 %v937_v48, %v1848_v11 }
 0x25c   : > { %1030 = vst [vmem:[%s1852_s24 + $0x180] sm:$0xff] %v936_v47 }
 0x25d   : > { %1031 = vst [vmem:[%s1852_s24 + $0x188] sm:$0xff] %v938_v49  ;;  %v941_v50 = vpop.f32.mrb[50].mxu1 }
 0x25e   : > { %v942_v51 = vadd.f32 %v941_v50, %v1846_v10  ;;  %v943_v52 = vpop.f32.mrb[51].mxu1 }
 0x25f   : > { %v944_v53 = vadd.f32 %v943_v52, %v1848_v11 }
 0x260   : > { %1032 = vst [vmem:[%s1852_s24 + $0x190] sm:$0xff] %v942_v51 }
 0x261   : > { %1033 = vst [vmem:[%s1852_s24 + $0x198] sm:$0xff] %v944_v53  ;;  %v947_v54 = vpop.f32.mrb[52].mxu1 }
 0x262   : > { %v948_v55 = vadd.f32 %v947_v54, %v1846_v10  ;;  %v949_v56 = vpop.f32.mrb[53].mxu1 }
 0x263   : > { %v950_v57 = vadd.f32 %v949_v56, %v1848_v11 }
 0x264   : > { %1034 = vst [vmem:[%s1852_s24 + $0x1a0] sm:$0xff] %v948_v55 }
 0x265   : > { %1035 = vst [vmem:[%s1852_s24 + $0x1a8] sm:$0xff] %v950_v57  ;;  %v953_v58 = vpop.f32.mrb[54].mxu1 }
 0x266   : > { %v954_v59 = vadd.f32 %v953_v58, %v1846_v10  ;;  %v955_v60 = vpop.f32.mrb[55].mxu1 }
 0x267   : > { %v956_v61 = vadd.f32 %v955_v60, %v1848_v11 }
 0x268   : > { %1036 = vst [vmem:[%s1852_s24 + $0x1b0] sm:$0xff] %v954_v59 }
 0x269   : > { %1037 = vst [vmem:[%s1852_s24 + $0x1b8] sm:$0xff] %v956_v61  ;;  %v959_v62 = vpop.f32.mrb[56].mxu1 }
 0x26a   : > { %v960_v63 = vadd.f32 %v959_v62, %v1846_v10  ;;  %v961_v0 = vpop.f32.mrb[57].mxu1 }
 0x26b   : > { %v962_v1 = vadd.f32 %v961_v0, %v1848_v11 }
 0x26c   : > { %1038 = vst [vmem:[%s1852_s24 + $0x1c0] sm:$0xff] %v960_v63 }
 0x26d   : > { %1039 = vst [vmem:[%s1852_s24 + $0x1c8] sm:$0xff] %v962_v1  ;;  %v965_v2 = vpop.f32.mrb[58].mxu1 }
 0x26e   : > { %v966_v3 = vadd.f32 %v965_v2, %v1846_v10  ;;  %v967_v4 = vpop.f32.mrb[59].mxu1 }
 0x26f   : > { %v968_v5 = vadd.f32 %v967_v4, %v1848_v11 }
 0x270   : > { %1040 = vst [vmem:[%s1852_s24 + $0x1d0] sm:$0xff] %v966_v3 }
 0x271   : > { %1041 = vst [vmem:[%s1852_s24 + $0x1d8] sm:$0xff] %v968_v5  ;;  %v971_v6 = vpop.f32.mrb[60].mxu1 }
 0x272   : > { %v972_v7 = vadd.f32 %v971_v6, %v1846_v10  ;;  %v973_v8 = vpop.f32.mrb[61].mxu1 }
 0x273   : > { %v974_v9 = vadd.f32 %v973_v8, %v1848_v11 }
 0x274   : > { %1042 = vst [vmem:[%s1852_s24 + $0x1e0] sm:$0xff] %v972_v7 }
 0x275   : > { %1043 = vst [vmem:[%s1852_s24 + $0x1e8] sm:$0xff] %v974_v9  ;;  %v977_v15 = vpop.f32.mrb[62].mxu1 }
 0x276   : > { %v978_v34 = vadd.f32 %v977_v15, %v1846_v10  ;;  %v979_v12 = vpop.f32.mrb[63].mxu1 }
 0x277   : > { %v980_v13 = vadd.f32 %v979_v12, %v1848_v11 }
 0x278   : > { %1044 = vst [vmem:[%s1852_s24 + $0x1f0] sm:$0xff] %v978_v34 }
 0x279   : > { %1045 = vst [vmem:[%s1852_s24 + $0x1f8] sm:$0xff] %v980_v13 }
 0x27a   : > { %1336 = shalt.err (!%p1333_p5)
}
 0x27b   : > { %s1337_s14 = scalar_lea.hbm %s1982_s9, 8192  ;;  %s1341_s16 = scalar_lea.hbm %s2042_s5, 16384 }
 0x27c   : > { %p1338_p6 = scmp.ne.s32.totalorder %s1982_s9, %s1337_s14  ;;  %p1342_p10 = scmp.lt.u32.totalorder %s1982_s9, %s2042_s5 }
 0x27d   : > { %p1343_p11 = scmp.lt.u32.totalorder %s1341_s16, %s1337_s14  ;;  %p1345_p13 = scmp.lt.u32.totalorder %s1337_s14, %s1982_s9 }
 0x27e   : > { %p1339_p7 = pnand %p1338_p6, %p1478_p4 }
 0x27f   : > { %p1344_p12 = por %p1343_p11, %p1342_p10 }
 0x280   : > { %p1340_p9 = pneg %p1339_p7 }
 0x281   : > { %p1346_p0 = por %p1345_p13, %p1344_p12 }
 0x283   : > { %p1347_p1 = pnand %p1346_p0, %p1340_p9 }
 0x285   : > { %1350 = shalt.err (!%p1347_p1)
}
 0x286   : > { %s1406_s25 = smov 256   ;;  %s1407_s29 = smov 16  }
 0x287   : > { %1264 = dma.vmem_to_hbm [thread:$0]  (%p1478_p4), %s1984_s27, 8192, %s1982_s9, %s1991_s21, %s1406_s25, %s1406_s25, %s1407_s29  }
 0x288 PF: > { %p1270_p2 = scmp.ge.s32.totalorder %s1401_s23, 2  ;;  %s1078_s7 = sand.u32 1, %s1381_s18  }
 0x289   : > { %s1079_s10 = scalar_lea.sflag [#allocation4], %s1078_s7 }
 0x28a   : > { %p1267_p3 = pnand %p1270_p2, %p1485_p8 }
 0x28c   : > { %1376 = dma.done.wait (!%p1267_p3), %s1079_s10, 8192  }
 0x28d   : > { %1378 = vsyncadd (!%p1267_p3), %s1079_s10, 4294959104  ;;  %s18_s23 = sadd.s32 1, %s1401_s23   ;;  %s2045_s18 = smov %s1385_s19 }
 0x28e   : > { %p15_p5 = scmp.ge.s32.totalorder %s18_s23, 4   ;;  %s2046_s19 = smov %s1389_s20 }
 0x28f   : > { %s2047_s20 = smov %s1491_s6  ;;  %s2048_s21 = smov %s1397_s22 }
 0x290   : > { %s2049_s22 = smov %s2051_s26  ;;  %17 = sbr.rel (!%p15_p5) target bundleno = 4 (0x4), region = 85 }
 0x297   :  { %1084 = vsyncpa [#allocation4], 1 }
 0x298   :  { %1086 = vsyncpa [#allocation4 + $0x1], 1 }

</bundles_post_ra>
